<compile_context>
chip_gen: v6e
topology: v6e:2x2x1
jax: 0.10.0
libtpu: 0.0.40
codegen_flags: <defaults>
</compile_context>

<pallas_src>
import functools
import math

import jax
import jax.numpy as jnp
from jax.experimental import pallas as pl
from jax.experimental.pallas import tpu as pltpu


def _round_up(x: int, m: int) -> int:
    return (x + m - 1) // m * m


def _router_kernel(x_ref, wt_ref, b_ref, o_ref, *, compute_dtype):
    # x_ref:  [TILE_N, H]   native input dtype (cast in-kernel if requested)
    # wt_ref: [H, M_pad]    pre-transposed weight, compute dtype
    # b_ref:  [1, M_pad]    f32
    # o_ref:  [TILE_N, M_pad]
    x = x_ref[...]
    if x.dtype != compute_dtype:
        x = x.astype(compute_dtype)
    acc = jnp.dot(x, wt_ref[...], preferred_element_type=jnp.float32)
    o_ref[...] = (acc + b_ref[...]).astype(o_ref.dtype)


def memory_router(x, weight, bias, *, tile_n: int = 1024, compute_dtype=None):
    """
    x:      [B, S, H]
    weight: [M, H]   (PyTorch nn.Linear convention: out_features x in_features)
    bias:   [M]
    returns [B, S, M] in x.dtype
    """
    B, S, H = x.shape
    M = weight.shape[0]
    N = B * S
    out_dtype = x.dtype
    if compute_dtype is None:
        compute_dtype = x.dtype
    compute_dtype = jnp.dtype(compute_dtype)

    # Lane-dense output: pad M (tiny) up to a multiple of 128 lanes.
    M_pad = _round_up(M, 128)

    x_item = jnp.dtype(x.dtype).itemsize
    w_item = compute_dtype.itemsize
    out_item = jnp.dtype(out_dtype).itemsize

    # --- size tile_n from the real VMEM footprint ---------------------------
    # x tile double-buffered + out tile double-buffered + resident weight/bias.
    VMEM_BUDGET = 48 * 1024 * 1024  # safe inside v7x's 64 MiB per-TC VMEM
    fixed = H * M_pad * w_item + M_pad * 4
    per_row = 2 * H * x_item + 2 * M_pad * out_item
    max_rows = max(16, (VMEM_BUDGET - fixed) // max(per_row, 1))
    tile_n = int(min(tile_n, max_rows))
    tile_n = max(16, (tile_n // 16) * 16)   # sublane-friendly for f32 and bf16
    tile_n = min(tile_n, _round_up(N, 16))  # don't over-tile tiny inputs

    footprint = fixed + tile_n * per_row
    vmem_limit = int(min(VMEM_BUDGET, max(footprint + (4 << 20), 16 << 20)))

    # --- prepare operands (no x copies: reshape is free, no pad, no cast) ---
    x2d = x.reshape(N, H)
    # Weight is tiny: one-time transpose+cast+pad in the wrapper.
    w_t = jnp.pad(weight.T.astype(compute_dtype), ((0, 0), (0, M_pad - M)))
    b2d = jnp.pad(bias.astype(jnp.float32), (0, M_pad - M)).reshape(1, M_pad)

    grid = (pl.cdiv(N, tile_n),)

    cost = pl.CostEstimate(
        flops=2 * N * H * M_pad,
        transcendentals=0,
        bytes_accessed=N * H * x_item + H * M_pad * w_item + N * M_pad * out_item,
    )

    kernel = functools.partial(_router_kernel, compute_dtype=compute_dtype)

    def _build(single_buffer_resident: bool):
        if single_buffer_resident:
            w_spec = pl.BlockSpec((H, M_pad), lambda i: (0, 0),
                                  pipeline_mode=pl.Buffered(1))
            b_spec = pl.BlockSpec((1, M_pad), lambda i: (0, 0),
                                  pipeline_mode=pl.Buffered(1))
        else:
            w_spec = pl.BlockSpec((H, M_pad), lambda i: (0, 0))
            b_spec = pl.BlockSpec((1, M_pad), lambda i: (0, 0))
        return pl.pallas_call(
            kernel,
            out_shape=jax.ShapeDtypeStruct((N, M_pad), out_dtype),
            grid=grid,
            in_specs=[
                pl.BlockSpec((tile_n, H), lambda i: (i, 0)),  # streamed x tiles
                w_spec,                                       # resident weight
                b_spec,                                       # resident bias
            ],
            out_specs=pl.BlockSpec((tile_n, M_pad), lambda i: (i, 0)),
            compiler_params=pltpu.CompilerParams(
                dimension_semantics=("parallel",),
                vmem_limit_bytes=vmem_limit,
            ),
            cost_estimate=cost,
        )

    try:
        out2d = _build(True)(x2d, w_t, b2d)
    except Exception:
        # Fallback if this JAX build rejects single-buffered pipeline_mode.
        out2d = _build(False)(x2d, w_t, b2d)

    return out2d[:, :M].reshape(B, S, M)


if __name__ == "__main__":
    # Small shapes consistent with the module's forward.
    B, S, H, M = 2, 8, 32, 4  # batch, seq, hidden_size, num_memories

    key = jax.random.PRNGKey(0)
    kx, kw, kb = jax.random.split(key, 3)

    x = jax.random.normal(kx, (B, S, H), dtype=jnp.float32)

    # Deterministic parameter init (mimics nn.Linear uniform(-1/sqrt(H), 1/sqrt(H)))
    bound = 1.0 / math.sqrt(H)
    weight = jax.random.uniform(kw, (M, H), dtype=jnp.float32, minval=-bound, maxval=bound)
    bias = jax.random.uniform(kb, (M,), dtype=jnp.float32, minval=-bound, maxval=bound)

    ref = x @ weight.T + bias

    # f32 path: exact validation.
    out = jax.block_until_ready(memory_router(x, weight, bias))
    assert out.shape == (B, S, M)
    assert jnp.allclose(out, ref, atol=1e-5, rtol=1e-5)

    # bf16 compute path: x stays f32 in HBM, cast happens inside the kernel.
    out_bf16 = jax.block_until_ready(
        memory_router(x, weight, bias, compute_dtype=jnp.bfloat16)
    )
    assert out_bf16.shape == (B, S, M)
    assert jnp.allclose(out_bf16, ref, atol=1e-1, rtol=1e-1)

    print("KERNEL_OK")
</pallas_src>

<mosaic_0001>
module attributes {stable_mosaic.version = 11 : i64} {
  func.func @_router_kernel(%arg0: i32, %arg1: memref<16x32xf32, #tpu.memory_space<vmem>>, %arg2: memref<32x128xf32, #tpu.memory_space<vmem>>, %arg3: memref<1x128xf32, #tpu.memory_space<vmem>>, %arg4: memref<16x128xf32, #tpu.memory_space<vmem>>) attributes {dimension_semantics = [#tpu.dimension_semantics<parallel>], iteration_bounds = array<i64: 1>, scalar_prefetch = 0 : i64, scratch_operands = 0 : i64, tpu.core_type = #tpu.core_type<tc>, window_params = [{transform_indices = @transform_0, window_bounds = array<i64: 16, 32>}, {pipeline_mode = #tpu.pipeline_mode<synchronous>, transform_indices = @transform_1, window_bounds = array<i64: 32, 128>}, {pipeline_mode = #tpu.pipeline_mode<synchronous>, transform_indices = @transform_2, window_bounds = array<i64: 1, 128>}, {transform_indices = @transform_3, window_bounds = array<i64: 16, 128>}]} {
    %c0 = arith.constant 0 : index
    %c0_0 = arith.constant 0 : index
    %0 = vector.load %arg1[%c0, %c0_0] : memref<16x32xf32, #tpu.memory_space<vmem>>, vector<16x32xf32>
    %c0_1 = arith.constant 0 : index
    %c0_2 = arith.constant 0 : index
    %1 = vector.load %arg2[%c0_1, %c0_2] : memref<32x128xf32, #tpu.memory_space<vmem>>, vector<32x128xf32>
    %cst = arith.constant dense<0.000000e+00> : vector<16x128xf32>
    %2 = tpu.matmul %0, %1, %cst {dimension_numbers = #tpu.dot_dimension_numbers<[1], [0], [0], [1], [0, 0, 1, 1], [], []>} : vector<16x32xf32>, vector<32x128xf32>, vector<16x128xf32> -> vector<16x128xf32>
    %c0_3 = arith.constant 0 : index
    %c0_4 = arith.constant 0 : index
    %3 = vector.load %arg3[%c0_3, %c0_4] : memref<1x128xf32, #tpu.memory_space<vmem>>, vector<1x128xf32>
    %4 = vector.broadcast %3 : vector<1x128xf32> to vector<16x128xf32>
    %5 = arith.addf %2, %4 : vector<16x128xf32>
    %c0_5 = arith.constant 0 : index
    %c0_6 = arith.constant 0 : index
    %6 = vector.load %arg4[%c0_5, %c0_6] : memref<16x128xf32, #tpu.memory_space<vmem>>, vector<16x128xf32>
    tpu.vector_store %arg4[%c0_5, %c0_6], %5 {strides = array<i32>} : memref<16x128xf32, #tpu.memory_space<vmem>>, vector<16x128xf32>,
    return
  }
  func.func @transform_0(%arg0: i32) -> (i32, i32) {
    %c0_i32 = arith.constant 0 : i32
    %c0_i32_0 = arith.constant 0 : i32
    return %arg0, %c0_i32 : i32, i32
  }
  func.func @transform_1(%arg0: i32) -> (i32, i32) {
    %c0_i32 = arith.constant 0 : i32
    %c0_i32_0 = arith.constant 0 : i32
    %c0_i32_1 = arith.constant 0 : i32
    return %c0_i32, %c0_i32_0 : i32, i32
  }
  func.func @transform_2(%arg0: i32) -> (i32, i32) {
    %c0_i32 = arith.constant 0 : i32
    %c0_i32_0 = arith.constant 0 : i32
    %c0_i32_1 = arith.constant 0 : i32
    return %c0_i32, %c0_i32_0 : i32, i32
  }
  func.func @transform_3(%arg0: i32) -> (i32, i32) {
    %c0_i32 = arith.constant 0 : i32
    %c0_i32_0 = arith.constant 0 : i32
    return %arg0, %c0_i32 : i32, i32
  }
}

module attributes {stable_mosaic.version = 11 : i64} {
  func.func @_router_kernel(%arg0: i32, %arg1: memref<16x32xf32, #tpu.memory_space<vmem>>, %arg2: memref<32x128xf32, #tpu.memory_space<vmem>>, %arg3: memref<1x128xf32, #tpu.memory_space<vmem>>, %arg4: memref<16x128xf32, #tpu.memory_space<vmem>>) attributes {dimension_semantics = [#tpu.dimension_semantics<parallel>], iteration_bounds = array<i64: 1>, scalar_prefetch = 0 : i64, scratch_operands = 0 : i64, tpu.core_type = #tpu.core_type<tc>, window_params = [{transform_indices = @transform_0, window_bounds = array<i64: 16, 32>}, {pipeline_mode = #tpu.pipeline_mode<synchronous>, transform_indices = @transform_1, window_bounds = array<i64: 32, 128>}, {pipeline_mode = #tpu.pipeline_mode<synchronous>, transform_indices = @transform_2, window_bounds = array<i64: 1, 128>}, {transform_indices = @transform_3, window_bounds = array<i64: 16, 128>}]} {
    %c0 = arith.constant 0 : index
    %c0_0 = arith.constant 0 : index
    %0 = vector.load %arg1[%c0, %c0_0] : memref<16x32xf32, #tpu.memory_space<vmem>>, vector<16x32xf32>
    %c0_1 = arith.constant 0 : index
    %c0_2 = arith.constant 0 : index
    %1 = vector.load %arg2[%c0_1, %c0_2] : memref<32x128xf32, #tpu.memory_space<vmem>>, vector<32x128xf32>
    %cst = arith.constant dense<0.000000e+00> : vector<16x128xf32>
    %2 = tpu.matmul %0, %1, %cst {dimension_numbers = #tpu.dot_dimension_numbers<[1], [0], [0], [1], [0, 0, 1, 1], [], []>} : vector<16x32xf32>, vector<32x128xf32>, vector<16x128xf32> -> vector<16x128xf32>
    %c0_3 = arith.constant 0 : index
    %c0_4 = arith.constant 0 : index
    %3 = vector.load %arg3[%c0_3, %c0_4] : memref<1x128xf32, #tpu.memory_space<vmem>>, vector<1x128xf32>
    %4 = vector.broadcast %3 : vector<1x128xf32> to vector<16x128xf32>
    %5 = arith.addf %2, %4 : vector<16x128xf32>
    %c0_5 = arith.constant 0 : index
    %c0_6 = arith.constant 0 : index
    %6 = vector.load %arg4[%c0_5, %c0_6] : memref<16x128xf32, #tpu.memory_space<vmem>>, vector<16x128xf32>
    tpu.vector_store %arg4[%c0_5, %c0_6], %5 {strides = array<i32>} : memref<16x128xf32, #tpu.memory_space<vmem>>, vector<16x128xf32>,
    return
  }
  func.func @transform_0(%arg0: i32) -> (i32, i32) {
    %c0_i32 = arith.constant 0 : i32
    %c0_i32_0 = arith.constant 0 : i32
    return %arg0, %c0_i32 : i32, i32
  }
  func.func @transform_1(%arg0: i32) -> (i32, i32) {
    %c0_i32 = arith.constant 0 : i32
    %c0_i32_0 = arith.constant 0 : i32
    %c0_i32_1 = arith.constant 0 : i32
    return %c0_i32, %c0_i32_0 : i32, i32
  }
  func.func @transform_2(%arg0: i32) -> (i32, i32) {
    %c0_i32 = arith.constant 0 : i32
    %c0_i32_0 = arith.constant 0 : i32
    %c0_i32_1 = arith.constant 0 : i32
    return %c0_i32, %c0_i32_0 : i32, i32
  }
  func.func @transform_3(%arg0: i32) -> (i32, i32) {
    %c0_i32 = arith.constant 0 : i32
    %c0_i32_0 = arith.constant 0 : i32
    return %arg0, %c0_i32 : i32, i32
  }
}

</mosaic_0001>

<bundles_post_ra>
// kernel: tpu_custom_call.1
= control target key start
LH: loop header
LB: loop body
LE: loop exit
PB: predicated region body
PF: predicated region fallthrough
CT: control target
= control target key end

     0   :  { %8 = vsyncpa [#allocation3], 0  ;;  %s297_s0 = inlined_call_operand.hbm [shape: f32[16,32], index: 0, kind: input, shape index: {}]   ;;  %s298_s1 = inlined_call_operand.hbm [shape: f32[32,128], index: 1, kind: input, shape index: {}]   ;;  %s299_s2 = inlined_call_operand.vmem [shape: f32[1,128], index: 2, kind: input, shape index: {}]   ;;  %s300_s3 = inlined_call_operand.hbm [shape: f32[16,128], index: 3, kind: output, shape index: {}]  }
   0x1   :  { %9 = vsyncpa [#allocation6], 0 }
   0x2   :  { %10 = vsyncpa [#allocation4], 0  ;;  %s249_s12 = smov [#allocation2]  }
   0x3   :  { %s16_s13 = sshll.u32 %s249_s12, 4  ;;  %s17_s13 = int_to_ptr.vmem [resolvable:$true] %s16_s13 }
   0x4   :  { %s191_s14 = scalar_lea.vmem %s17_s13, 256  ;;  %p196_p1 = scmp.lt.s32.totalorder %s17_s13, %s17_s13 }
   0x5   :  { %p192_p0 = scmp.ne.s32.totalorder %s17_s13, %s191_s14  ;;  %p197_p2 = scmp.lt.s32.totalorder %s191_s14, %s191_s14 }
   0x7   :  { %p198_p3 = por %p197_p2, %p196_p1 }
   0x9   :  { %p199_p4 = pnand %p198_p3, %p192_p0 }
   0xb   :  { %202 = shalt.err (!%p199_p4)
}
   0xc   :  { %s250_s15 = smov 128   ;;  %s251_s16 = smov 8  }
   0xd   :  { %22 = dma.hbm_to_vmem [thread:$0]  %s297_s0, 256, %s17_s13, [#allocation3], %s250_s15, %s250_s15, %s251_s16  }
   0xe   :  { %s252_s19 = smov [#allocation5]  }
   0xf   :  { %s28_s20 = sshll.u32 %s252_s19, 4  ;;  %s29_s20 = int_to_ptr.vmem [resolvable:$true] %s28_s20 }
  0x10   :  { %s211_s21 = scalar_lea.vmem %s29_s20, 512  ;;  %p216_p6 = scmp.lt.s32.totalorder %s29_s20, %s29_s20 }
  0x11   :  { %p212_p5 = scmp.ne.s32.totalorder %s29_s20, %s211_s21  ;;  %p217_p7 = scmp.lt.s32.totalorder %s211_s21, %s211_s21 }
  0x13   :  { %p218_p8 = por %p217_p7, %p216_p6 }
  0x15   :  { %p219_p9 = pnand %p218_p8, %p212_p5 }
  0x17   :  { %222 = shalt.err (!%p219_p9)
}
  0x18   :  { %34 = dma.hbm_to_vmem [thread:$0]  %s298_s1, 512, %s29_s20, [#allocation6], %s250_s15, %s250_s15, %s251_s16  }
  0x19   :  { %243 = dma.done.wait [#allocation3], 256  }
  0x1a   :  { %244 = vsyncadd [#allocation3], 4294967040 }
  0x1b   :  { %245 = dma.done.wait [#allocation6], 512  }
  0x1c   :  { %246 = vsyncadd [#allocation6], 4294966784  ;;  %vm56_vm0 = vcmask 261120   ;;  %v48_v0 = vld [vmem:[#allocation5 + $0x18] sm:$0xff]  ;;  %v47_v1 = vld [vmem:[#allocation5 + $0x10] sm:$0xff]  ;;  %s253_s24 = smov [#allocation7]  }
  0x1d   :  { %167 = vmatprep.subr.mxu0 %v48_v0  ;;  %v43_v2 = vld [vmem:[#allocation2] sm:$0xff]  ;;  %v46_v3 = vld [vmem:[#allocation5 + $0x8] sm:$0xff]  ;;  %v45_v4 = vld [vmem:[#allocation5] sm:$0xff]  ;;  %s145_s25 = sshll.u32 %s253_s24, 4  ;;  %s146_s25 = int_to_ptr.vmem [resolvable:$true] %s145_s25 }
  0x1e   :  { %168 = vmatpush3.msra.mxu0 %v48_v0  ;;  %175 = vmatprep.mubr.msk.f32.mxu0 %vm56_vm0, %v43_v2  ;;  %v44_v5 = vld [vmem:[#allocation2 + $0x8] sm:$0xff]  ;;  %v158_v6 = vld [vmem:[%s299_s2] ss:$0 sm:$0xff]  ;;  %s223_s26 = scalar_lea.vmem %s146_s25, 256  ;;  %p228_p11 = scmp.lt.s32.totalorder %s146_s25, %s146_s25 }
  0x1f   :  { %169 = vmatprep.subr.mxu0 %v47_v1  ;;  %p224_p10 = scmp.ne.s32.totalorder %s146_s25, %s223_s26  ;;  %p229_p12 = scmp.lt.s32.totalorder %s223_s26, %s223_s26 }
  0x20   :  { %170 = vmatpush3.msra.mxu0 %v47_v1 }
  0x21   :  { %171 = vmatprep.subr.mxu0 %v46_v3  ;;  %p230_p13 = por %p229_p12, %p228_p11 }
  0x22   :  { %172 = vmatpush3.msra.mxu0 %v46_v3 }
  0x23   :  { %173 = vmatprep.subr.mxu0 %v45_v4  ;;  %p231_p0 = pnand %p230_p13, %p224_p10 }
  0x24   :  { %174 = vmatpush3.msra.mxu0 %v45_v4 }
  0x25   :  { %176 = vmatmul.mubr.msk.f32.vlgmr.msra.gmra.mxu0 %vm56_vm0, %v44_v5 }
  0xe5   :  { %v177_v7 = vpop.f32.mrf.mxu0 }
  0xe6   :  { %v135_v8 = vadd.f32 %v177_v7, %v158_v6 }
  0xe7   :  { %v129_v9 = vpop.f32.mrf.mxu0 }
  0xe8   :  { %139 = vst [vmem:[#allocation7 + $0x8] sm:$0xff] %v135_v8  ;;  %v130_v10 = vadd.f32 %v158_v6, %v129_v9 }
  0xea   :  { %138 = vst [vmem:[#allocation7] sm:$0xff] %v130_v10 }
  0xeb   :  { %234 = shalt.err (!%p231_p0)
}
  0xec   :  { %151 = dma.vmem_to_hbm [thread:$0]  %s146_s25, 256, %s300_s3, [#allocation4], %s250_s15, %s250_s15, %s251_s16  }
  0xed   :  { %247 = dma.done.wait [#allocation4], 256  }
  0xee   :  { %248 = vsyncadd [#allocation4], 4294967040 }
  0xef   :  { %155 = vsyncpa [#allocation3], 1 }
  0xf0   :  { %156 = vsyncpa [#allocation6], 1 }
  0xf1   :  { %157 = vsyncpa [#allocation4], 1 }

// kernel: tpu_custom_call.1
= control target key start
LH: loop header
LB: loop body
LE: loop exit
PB: predicated region body
PF: predicated region fallthrough
CT: control target
= control target key end

     0   :  { %8 = vsyncpa [#allocation3], 0  ;;  %s297_s0 = inlined_call_operand.hbm [shape: f32[16,32], index: 0, kind: input, shape index: {}]   ;;  %s298_s1 = inlined_call_operand.hbm [shape: f32[32,128], index: 1, kind: input, shape index: {}]   ;;  %s299_s2 = inlined_call_operand.vmem [shape: f32[1,128], index: 2, kind: input, shape index: {}]   ;;  %s300_s3 = inlined_call_operand.hbm [shape: f32[16,128], index: 3, kind: output, shape index: {}]  }
   0x1   :  { %9 = vsyncpa [#allocation6], 0 }
   0x2   :  { %10 = vsyncpa [#allocation4], 0  ;;  %s249_s12 = smov [#allocation2]  }
   0x3   :  { %s16_s13 = sshll.u32 %s249_s12, 4  ;;  %s17_s13 = int_to_ptr.vmem [resolvable:$true] %s16_s13 }
   0x4   :  { %s191_s14 = scalar_lea.vmem %s17_s13, 256  ;;  %p196_p1 = scmp.lt.s32.totalorder %s17_s13, %s17_s13 }
   0x5   :  { %p192_p0 = scmp.ne.s32.totalorder %s17_s13, %s191_s14  ;;  %p197_p2 = scmp.lt.s32.totalorder %s191_s14, %s191_s14 }
   0x7   :  { %p198_p3 = por %p197_p2, %p196_p1 }
   0x9   :  { %p199_p4 = pnand %p198_p3, %p192_p0 }
   0xb   :  { %202 = shalt.err (!%p199_p4)
}
   0xc   :  { %s250_s15 = smov 128   ;;  %s251_s16 = smov 8  }
   0xd   :  { %22 = dma.hbm_to_vmem [thread:$0]  %s297_s0, 256, %s17_s13, [#allocation3], %s250_s15, %s250_s15, %s251_s16  }
   0xe   :  { %s252_s19 = smov [#allocation5]  }
   0xf   :  { %s28_s20 = sshll.u32 %s252_s19, 4  ;;  %s29_s20 = int_to_ptr.vmem [resolvable:$true] %s28_s20 }
  0x10   :  { %s211_s21 = scalar_lea.vmem %s29_s20, 512  ;;  %p216_p6 = scmp.lt.s32.totalorder %s29_s20, %s29_s20 }
  0x11   :  { %p212_p5 = scmp.ne.s32.totalorder %s29_s20, %s211_s21  ;;  %p217_p7 = scmp.lt.s32.totalorder %s211_s21, %s211_s21 }
  0x13   :  { %p218_p8 = por %p217_p7, %p216_p6 }
  0x15   :  { %p219_p9 = pnand %p218_p8, %p212_p5 }
  0x17   :  { %222 = shalt.err (!%p219_p9)
}
  0x18   :  { %34 = dma.hbm_to_vmem [thread:$0]  %s298_s1, 512, %s29_s20, [#allocation6], %s250_s15, %s250_s15, %s251_s16  }
  0x19   :  { %243 = dma.done.wait [#allocation3], 256  }
  0x1a   :  { %244 = vsyncadd [#allocation3], 4294967040 }
  0x1b   :  { %245 = dma.done.wait [#allocation6], 512  }
  0x1c   :  { %246 = vsyncadd [#allocation6], 4294966784  ;;  %vm56_vm0 = vcmask 261120   ;;  %v48_v0 = vld [vmem:[#allocation5 + $0x18] sm:$0xff]  ;;  %v47_v1 = vld [vmem:[#allocation5 + $0x10] sm:$0xff]  ;;  %s253_s24 = smov [#allocation7]  }
  0x1d   :  { %167 = vmatprep.subr.mxu0 %v48_v0  ;;  %v43_v2 = vld [vmem:[#allocation2] sm:$0xff]  ;;  %v46_v3 = vld [vmem:[#allocation5 + $0x8] sm:$0xff]  ;;  %v45_v4 = vld [vmem:[#allocation5] sm:$0xff]  ;;  %s145_s25 = sshll.u32 %s253_s24, 4  ;;  %s146_s25 = int_to_ptr.vmem [resolvable:$true] %s145_s25 }
  0x1e   :  { %168 = vmatpush3.msra.mxu0 %v48_v0  ;;  %175 = vmatprep.mubr.msk.f32.mxu0 %vm56_vm0, %v43_v2  ;;  %v44_v5 = vld [vmem:[#allocation2 + $0x8] sm:$0xff]  ;;  %v158_v6 = vld [vmem:[%s299_s2] ss:$0 sm:$0xff]  ;;  %s223_s26 = scalar_lea.vmem %s146_s25, 256  ;;  %p228_p11 = scmp.lt.s32.totalorder %s146_s25, %s146_s25 }
  0x1f   :  { %169 = vmatprep.subr.mxu0 %v47_v1  ;;  %p224_p10 = scmp.ne.s32.totalorder %s146_s25, %s223_s26  ;;  %p229_p12 = scmp.lt.s32.totalorder %s223_s26, %s223_s26 }
  0x20   :  { %170 = vmatpush3.msra.mxu0 %v47_v1 }
  0x21   :  { %171 = vmatprep.subr.mxu0 %v46_v3  ;;  %p230_p13 = por %p229_p12, %p228_p11 }
  0x22   :  { %172 = vmatpush3.msra.mxu0 %v46_v3 }
  0x23   :  { %173 = vmatprep.subr.mxu0 %v45_v4  ;;  %p231_p0 = pnand %p230_p13, %p224_p10 }
  0x24   :  { %174 = vmatpush3.msra.mxu0 %v45_v4 }
  0x25   :  { %176 = vmatmul.mubr.msk.f32.vlgmr.msra.gmra.mxu0 %vm56_vm0, %v44_v5 }
  0xe5   :  { %v177_v7 = vpop.f32.mrf.mxu0 }
  0xe6   :  { %v135_v8 = vadd.f32 %v177_v7, %v158_v6 }
  0xe7   :  { %v129_v9 = vpop.f32.mrf.mxu0 }
  0xe8   :  { %139 = vst [vmem:[#allocation7 + $0x8] sm:$0xff] %v135_v8  ;;  %v130_v10 = vadd.f32 %v158_v6, %v129_v9 }
  0xea   :  { %138 = vst [vmem:[#allocation7] sm:$0xff] %v130_v10 }
  0xeb   :  { %234 = shalt.err (!%p231_p0)
}
  0xec   :  { %151 = dma.vmem_to_hbm [thread:$0]  %s146_s25, 256, %s300_s3, [#allocation4], %s250_s15, %s250_s15, %s251_s16  }
  0xed   :  { %247 = dma.done.wait [#allocation4], 256  }
  0xee   :  { %248 = vsyncadd [#allocation4], 4294967040 }
  0xef   :  { %155 = vsyncpa [#allocation3], 1 }
  0xf0   :  { %156 = vsyncpa [#allocation6], 1 }
  0xf1   :  { %157 = vsyncpa [#allocation4], 1 }

</bundles_post_ra>
